<compile_context>
chip_gen: v7x
topology: tpu7x:2x2x1
jax: 0.10.0
libtpu: 0.0.40
codegen_flags: <defaults>
</compile_context>

<pallas_src>
import functools

import jax
import jax.numpy as jnp
from jax.experimental import pallas as pl
from jax.experimental.pallas import tpu as pltpu


# -----------------------------------------------------------------------------
# Packed-parameter layout (row offsets are 8-aligned for clean sublane slices)
# -----------------------------------------------------------------------------
def _align8(x):
    return ((x + 7) // 8) * 8


def _packed_layout(state_dim, num_actions, h1, h2):
    """Row layout of the single packed weight buffer, all rows Wmax lanes wide."""
    wmax = max(2 * h1, 2 * h2, 2 * num_actions)
    offs = {}
    row = 0

    def seg(name, n_rows):
        nonlocal row
        offs[name] = row
        row = _align8(row + n_rows)

    seg("w1s", state_dim)      # fused w1, rows for the state part
    seg("w1a", num_actions)    # fused w1, rows for the action part
    seg("b1", 1)
    seg("w2", wmax)            # block-diagonal fused w2 (zero padded)
    seg("b2", 1)
    seg("w3", wmax)            # block-diagonal fused w3 (zero padded)
    seg("b3", 1)
    total_rows = row
    return wmax, offs, total_rows


def pack_critic_params(params, state_dim, num_actions, layer_sizes):
    """Build the packed fused weight buffer ONCE (outside the hot path)."""
    h1, h2 = layer_sizes
    S, A = state_dim, num_actions
    wmax, offs, total = _packed_layout(S, A, h1, h2)

    # Fused layer 1: concat heads along the output axis.
    w1f = jnp.concatenate([params["q1_w1"], params["q2_w1"]], axis=1)  # (S+A, 2h1)
    b1f = jnp.concatenate([params["q1_b1"], params["q2_b1"]], axis=1)  # (1, 2h1)
    # Fused layer 2/3: block diagonal.
    w2f = jnp.zeros((2 * h1, 2 * h2), jnp.float32)
    w2f = w2f.at[:h1, :h2].set(params["q1_w2"]).at[h1:, h2:].set(params["q2_w2"])
    b2f = jnp.concatenate([params["q1_b2"], params["q2_b2"]], axis=1)  # (1, 2h2)
    w3f = jnp.zeros((2 * h2, 2 * A), jnp.float32)
    w3f = w3f.at[:h2, :A].set(params["q1_w3"]).at[h2:, A:].set(params["q2_w3"])
    b3f = jnp.concatenate([params["q1_b3"], params["q2_b3"]], axis=1)  # (1, 2A)

    packed = jnp.zeros((total, wmax), jnp.float32)

    def put(buf, name, arr):
        r0 = offs[name]
        return buf.at[r0:r0 + arr.shape[0], :arr.shape[1]].set(arr)

    packed = put(packed, "w1s", w1f[:S])
    packed = put(packed, "w1a", w1f[S:])
    packed = put(packed, "b1", b1f)
    packed = put(packed, "w2", w2f)
    packed = put(packed, "b2", b2f)
    packed = put(packed, "w3", w3f)
    packed = put(packed, "b3", b3f)
    return packed


# -----------------------------------------------------------------------------
# Kernel: fused two-head 3-layer MLP, one batch tile per grid step.
# -----------------------------------------------------------------------------
def _make_critic_kernel(S, A, wmax, offs):
    o_w1s, o_w1a = offs["w1s"], offs["w1a"]
    o_b1, o_w2, o_b2, o_w3, o_b3 = offs["b1"], offs["w2"], offs["b2"], offs["w3"], offs["b3"]

    def kernel(st_ref, ac_ref, pk_ref, out_ref):
        st = st_ref[...]                                   # (TB, S)
        ac = ac_ref[...]                                   # (TB, A)

        w1s = pk_ref[o_w1s:o_w1s + S, :]                   # (S, wmax)
        w1a = pk_ref[o_w1a:o_w1a + A, :]                   # (A, wmax)
        b1 = pk_ref[o_b1:o_b1 + 1, :]                      # (1, wmax)
        w2 = pk_ref[o_w2:o_w2 + wmax, :]                   # (wmax, wmax)
        b2 = pk_ref[o_b2:o_b2 + 1, :]
        w3 = pk_ref[o_w3:o_w3 + wmax, :]                   # (wmax, wmax)
        b3 = pk_ref[o_b3:o_b3 + 1, :]

        # Layer 1: split matmul avoids any concat(states, actions).
        h1 = (jnp.dot(st, w1s, preferred_element_type=jnp.float32)
              + jnp.dot(ac, w1a, preferred_element_type=jnp.float32) + b1)
        h1 = jnp.maximum(h1, 0.0)
        # Layer 2 (block-diagonal fused heads).
        h2 = jnp.maximum(
            jnp.dot(h1, w2, preferred_element_type=jnp.float32) + b2, 0.0)
        # Layer 3: columns [0:A] are q1, [A:2A] are q2, rest zero padding.
        out_ref[...] = jnp.dot(h2, w3, preferred_element_type=jnp.float32) + b3

    return kernel


# -----------------------------------------------------------------------------
# Wrapper
# -----------------------------------------------------------------------------
def critic_forward(states, actions, packed, *, num_actions, layer_sizes,
                   tile_b=256):
    """Pallas equivalent of Critic.forward.

    states : (B, state_dim) f32
    actions: (B, num_actions) f32
    packed : packed fused params from pack_critic_params
    returns: (q1_values, q2_values), each (B, num_actions) f32
    """
    B, S = states.shape
    A = actions.shape[1]
    h1, h2 = layer_sizes
    wmax, offs, total = _packed_layout(S, A, h1, h2)
    assert packed.shape == (total, wmax)

    # Small batch -> single full-array block; large batch -> row-tiled,
    # "parallel" grid so the x-tile DMA pipelines and v7x's 2 TCs split it.
    tb = B if B <= tile_b else tile_b
    grid = (pl.cdiv(B, tb),)

    out = pl.pallas_call(
        _make_critic_kernel(S, A, wmax, offs),
        out_shape=jax.ShapeDtypeStruct((B, wmax), jnp.float32),
        grid=grid,
        in_specs=[
            pl.BlockSpec((tb, S), lambda i: (i, 0)),
            pl.BlockSpec((tb, A), lambda i: (i, 0)),
            pl.BlockSpec((total, wmax), lambda i: (0, 0)),  # weights stay resident
        ],
        out_specs=pl.BlockSpec((tb, wmax), lambda i: (i, 0)),
        compiler_params=pltpu.CompilerParams(
            dimension_semantics=("parallel",)),
    )(states, actions, packed)

    q1 = out[:, :num_actions]
    q2 = out[:, num_actions:2 * num_actions]
    return q1, q2


# -----------------------------------------------------------------------------
# Deterministic parameter init (mirrors nn.Linear shapes; stored transposed)
# -----------------------------------------------------------------------------
def init_critic_params(key, state_dim, num_actions, layer_sizes):
    d_in = state_dim + num_actions
    h1, h2 = layer_sizes
    dims = [(d_in, h1), (h1, h2), (h2, num_actions)]

    params = {}
    keys = jax.random.split(key, 12)
    k = 0
    for head in ("q1", "q2"):
        for li, (fan_in, fan_out) in enumerate(dims, start=1):
            bound = 1.0 / jnp.sqrt(jnp.float32(fan_in))
            w = jax.random.uniform(keys[k], (fan_in, fan_out),
                                   minval=-bound, maxval=bound,
                                   dtype=jnp.float32)
            b = jax.random.uniform(keys[k + 1], (1, fan_out),
                                   minval=-bound, maxval=bound,
                                   dtype=jnp.float32)
            params[f"{head}_w{li}"] = w
            params[f"{head}_b{li}"] = b
            k += 2
    return params


# -----------------------------------------------------------------------------
# Main
# -----------------------------------------------------------------------------
if __name__ == "__main__":
    key = jax.random.PRNGKey(0)
    k_params, k_states, k_actions = jax.random.split(key, 3)

    batch = 8
    state_dim = 16
    num_actions = 4
    layer_sizes = (32, 32)

    params = init_critic_params(k_params, state_dim, num_actions, layer_sizes)
    # Fused/packed weights are built once, outside the forward hot path.
    packed = jax.block_until_ready(
        pack_critic_params(params, state_dim, num_actions, layer_sizes))

    states = jax.random.normal(k_states, (batch, state_dim), dtype=jnp.float32)
    actions = jax.random.normal(k_actions, (batch, num_actions), dtype=jnp.float32)

    fwd = jax.jit(functools.partial(critic_forward,
                                    num_actions=num_actions,
                                    layer_sizes=layer_sizes))
    q1, q2 = fwd(states, actions, packed)
    jax.block_until_ready((q1, q2))

    # Pure-JAX reference check of the Pallas kernel.
    def ref_head(x, p, head):
        h = jnp.maximum(x @ p[f"{head}_w1"] + p[f"{head}_b1"], 0.0)
        h = jnp.maximum(h @ p[f"{head}_w2"] + p[f"{head}_b2"], 0.0)
        return h @ p[f"{head}_w3"] + p[f"{head}_b3"]

    x = jnp.concatenate([states, actions], axis=1)
    r1 = ref_head(x, params, "q1")
    r2 = ref_head(x, params, "q2")
    assert jnp.allclose(q1, r1, atol=1e-5, rtol=1e-5)
    assert jnp.allclose(q2, r2, atol=1e-5, rtol=1e-5)

    print("KERNEL_OK")
</pallas_src>

<mosaic_0001>
module attributes {stable_mosaic.version = 11 : i64} {
  func.func @kernel(%arg0: i32, %arg1: memref<8x16xf32, #tpu.memory_space<vmem>>, %arg2: memref<8x4xf32, #tpu.memory_space<vmem>>, %arg3: memref<176x64xf32, #tpu.memory_space<vmem>>, %arg4: memref<8x64xf32, #tpu.memory_space<vmem>>) attributes {dimension_semantics = [#tpu.dimension_semantics<parallel>], iteration_bounds = array<i64: 1>, scalar_prefetch = 0 : i64, scratch_operands = 0 : i64, tpu.core_type = #tpu.core_type<tc>, window_params = [{transform_indices = @transform_0, window_bounds = array<i64: 8, 16>}, {transform_indices = @transform_1, window_bounds = array<i64: 8, 4>}, {pipeline_mode = #tpu.pipeline_mode<synchronous>, transform_indices = @transform_2, window_bounds = array<i64: 176, 64>}, {transform_indices = @transform_3, window_bounds = array<i64: 8, 64>}]} {
    %c0 = arith.constant 0 : index
    %c0_0 = arith.constant 0 : index
    %0 = vector.load %arg1[%c0, %c0_0] : memref<8x16xf32, #tpu.memory_space<vmem>>, vector<8x16xf32>
    %c0_1 = arith.constant 0 : index
    %c0_2 = arith.constant 0 : index
    %1 = vector.load %arg2[%c0_1, %c0_2] : memref<8x4xf32, #tpu.memory_space<vmem>>, vector<8x4xf32>
    %c0_3 = arith.constant 0 : index
    %c0_4 = arith.constant 0 : index
    %2 = vector.load %arg3[%c0_3, %c0_4] : memref<176x64xf32, #tpu.memory_space<vmem>>, vector<16x64xf32>
    %c16 = arith.constant 16 : index
    %c0_5 = arith.constant 0 : index
    %3 = vector.load %arg3[%c16, %c0_5] : memref<176x64xf32, #tpu.memory_space<vmem>>, vector<4x64xf32>
    %c24 = arith.constant 24 : index
    %c0_6 = arith.constant 0 : index
    %4 = vector.load %arg3[%c24, %c0_6] : memref<176x64xf32, #tpu.memory_space<vmem>>, vector<1x64xf32>
    %c32 = arith.constant 32 : index
    %c0_7 = arith.constant 0 : index
    %5 = vector.load %arg3[%c32, %c0_7] : memref<176x64xf32, #tpu.memory_space<vmem>>, vector<64x64xf32>
    %c96 = arith.constant 96 : index
    %c0_8 = arith.constant 0 : index
    %6 = vector.load %arg3[%c96, %c0_8] : memref<176x64xf32, #tpu.memory_space<vmem>>, vector<1x64xf32>
    %c104 = arith.constant 104 : index
    %c0_9 = arith.constant 0 : index
    %7 = vector.load %arg3[%c104, %c0_9] : memref<176x64xf32, #tpu.memory_space<vmem>>, vector<64x64xf32>
    %c168 = arith.constant 168 : index
    %c0_10 = arith.constant 0 : index
    %8 = vector.load %arg3[%c168, %c0_10] : memref<176x64xf32, #tpu.memory_space<vmem>>, vector<1x64xf32>
    %cst = arith.constant dense<0.000000e+00> : vector<8x64xf32>
    %9 = tpu.matmul %0, %2, %cst {dimension_numbers = #tpu.dot_dimension_numbers<[1], [0], [0], [1], [0, 0, 1, 1], [], []>} : vector<8x16xf32>, vector<16x64xf32>, vector<8x64xf32> -> vector<8x64xf32>
    %cst_11 = arith.constant dense<0.000000e+00> : vector<8x64xf32>
    %10 = tpu.matmul %1, %3, %cst_11 {dimension_numbers = #tpu.dot_dimension_numbers<[1], [0], [0], [1], [0, 0, 1, 1], [], []>} : vector<8x4xf32>, vector<4x64xf32>, vector<8x64xf32> -> vector<8x64xf32>
    %11 = arith.addf %9, %10 : vector<8x64xf32>
    %12 = vector.broadcast %4 : vector<1x64xf32> to vector<8x64xf32>
    %13 = arith.addf %11, %12 : vector<8x64xf32>
    %cst_12 = arith.constant 0.000000e+00 : f32
    %14 = vector.broadcast %cst_12 : f32 to vector<8x64xf32>
    %15 = arith.maximumf %13, %14 : vector<8x64xf32>
    %cst_13 = arith.constant dense<0.000000e+00> : vector<8x64xf32>
    %16 = tpu.matmul %15, %5, %cst_13 {dimension_numbers = #tpu.dot_dimension_numbers<[1], [0], [0], [1], [0, 0, 1, 1], [], []>} : vector<8x64xf32>, vector<64x64xf32>, vector<8x64xf32> -> vector<8x64xf32>
    %17 = vector.broadcast %6 : vector<1x64xf32> to vector<8x64xf32>
    %18 = arith.addf %16, %17 : vector<8x64xf32>
    %cst_14 = arith.constant 0.000000e+00 : f32
    %19 = vector.broadcast %cst_14 : f32 to vector<8x64xf32>
    %20 = arith.maximumf %18, %19 : vector<8x64xf32>
    %cst_15 = arith.constant dense<0.000000e+00> : vector<8x64xf32>
    %21 = tpu.matmul %20, %7, %cst_15 {dimension_numbers = #tpu.dot_dimension_numbers<[1], [0], [0], [1], [0, 0, 1, 1], [], []>} : vector<8x64xf32>, vector<64x64xf32>, vector<8x64xf32> -> vector<8x64xf32>
    %22 = vector.broadcast %8 : vector<1x64xf32> to vector<8x64xf32>
    %23 = arith.addf %21, %22 : vector<8x64xf32>
    %c0_16 = arith.constant 0 : index
    %c0_17 = arith.constant 0 : index
    %24 = vector.load %arg4[%c0_16, %c0_17] : memref<8x64xf32, #tpu.memory_space<vmem>>, vector<8x64xf32>
    tpu.vector_store %arg4[%c0_16, %c0_17], %23 {strides = array<i32>} : memref<8x64xf32, #tpu.memory_space<vmem>>, vector<8x64xf32>,
    return
  }
  func.func @transform_0(%arg0: i32) -> (i32, i32) {
    %c0_i32 = arith.constant 0 : i32
    %c0_i32_0 = arith.constant 0 : i32
    return %arg0, %c0_i32 : i32, i32
  }
  func.func @transform_1(%arg0: i32) -> (i32, i32) {
    %c0_i32 = arith.constant 0 : i32
    %c0_i32_0 = arith.constant 0 : i32
    return %arg0, %c0_i32 : i32, i32
  }
  func.func @transform_2(%arg0: i32) -> (i32, i32) {
    %c0_i32 = arith.constant 0 : i32
    %c0_i32_0 = arith.constant 0 : i32
    %c0_i32_1 = arith.constant 0 : i32
    return %c0_i32, %c0_i32_0 : i32, i32
  }
  func.func @transform_3(%arg0: i32) -> (i32, i32) {
    %c0_i32 = arith.constant 0 : i32
    %c0_i32_0 = arith.constant 0 : i32
    return %arg0, %c0_i32 : i32, i32
  }
}

</mosaic_0001>

<bundles_post_ra>
// kernel: critic_forward.1
= control target key start
LH: loop header
LB: loop body
LE: loop exit
PB: predicated region body
PF: predicated region fallthrough
CT: control target
= control target key end

     0   :  { %vm42_vm0 = vcmask 1043456   ;;  %v468_v0 = vmov 0.0|0.0   ;;  %v469_v1 = vmov 0.0   ;;  %vm38_vm1 = vcmask 31744   ;;  %s573_s2 = inlined_call_operand.vmem [shape: f32[176,64], index: 2, kind: input, shape index: {}]   ;;  %s574_s1 = inlined_call_operand.vmem [shape: f32[8,4], index: 1, kind: input, shape index: {}]   ;;  %s575_s0 = inlined_call_operand.vmem [shape: f32[8,16], index: 0, kind: input, shape index: {}]   ;;  %s576_s3 = inlined_call_operand.vmem [shape: f32[8,64], index: 3, kind: output, shape index: {}]  }
   0x1   :  { %438 = vmatprep.subr.bf16.mxu1 %v468_v0  ;;  %388 = vmatprep.subr.mxu0 %v469_v1  ;;  %v16_v2 = vld [vmem:[%s573_s2] sm:$0xff]  ;;  %v17_v3 = vld [vmem:[%s573_s2 + $0x8] sm:$0xff]  ;;  %v18_v4 = vld [vmem:[%s573_s2 + $0x10] sm:$0xf]  ;;  %vm470_vm2 = vmmov 0   ;;  %vm116_vm3 = vcmask 130048  }
   0x2   :  { %v439_v5 = vpack.c.bf16 %v17_v3, %v16_v2  ;;  %389 = vmatpush3.msk.msra.mxu0 %vm42_vm0, %v18_v4  ;;  %390 = vmatprep.mubr.msk.f32.mxu0 %vm470_vm2, %v469_v1  ;;  %v15_v6 = vld [vmem:[%s574_s1] sm:$0xff]  ;;  %v21_v8 = vld [vmem:[%s573_s2 + $0x28] sm:$0xff]  ;;  %v22_v9 = vld [vmem:[%s573_s2 + $0x30] sm:$0xff]  ;;  %vm200_vm4 = vcmask 523264  }
   0x3   :  { %v20_v7 = vld [vmem:[%s573_s2 + $0x20] sm:$0xff]  ;;  %391 = vmatmul.mubr.msk.f32.vlgmr.msra.gmra.mrb[0].mxu0 %vm38_vm1, %v15_v6  ;;  %397 = vmatprep.mubr.msk.f32.mxu1 %vm470_vm2, %v469_v1  ;;  %v23_v10 = vld [vmem:[%s573_s2 + $0x38] sm:$0xff]  ;;  %v25_v15 = vld [vmem:[%s573_s2 + $0x48] sm:$0xff] }
   0x4   :  { %440 = vmatpush3.bf16.msra.mxu1 %v439_v5  ;;  %v14_v11 = vld [vmem:[%s575_s0] sm:$0xff]  ;;  %441 = vmatprep.subr.bf16.mxu0 %v468_v0  ;;  %v442_v12 = vpack.c.bf16 %v21_v8, %v20_v7  ;;  %v445_v13 = vpack.c.bf16 %v23_v10, %v22_v9  ;;  %v26_v17 = vld [vmem:[%s573_s2 + $0x50] sm:$0xff]  ;;  %v27_v18 = vld [vmem:[%s573_s2 + $0x58] sm:$0xff] }
   0x5   :  { %416 = vmatprep.mubr.msk.f32.mxu0 %vm470_vm2, %v469_v1  ;;  %453 = vmatprep.subr.bf16.mxu1 %v468_v0  ;;  %v24_v14 = vld [vmem:[%s573_s2 + $0x40] sm:$0xff]  ;;  %v451_v19 = vpack.c.bf16 %v27_v18, %v26_v17  ;;  %v29_v20 = vld [vmem:[%s573_s2 + $0x68] sm:$0xff]  ;;  %v30_v21 = vld [vmem:[%s573_s2 + $0x70] sm:$0xff] }
   0x6   :  { %443 = vmatpush3.bf16.msra.mxu0 %v442_v12  ;;  %v448_v16 = vpack.c.bf16 %v25_v15, %v24_v14  ;;  %v31_v22 = vld [vmem:[%s573_s2 + $0x78] sm:$0xff]  ;;  %v454_v23 = vpack.c.bf16 %v30_v21, %v29_v20  ;;  %v32_v24 = vld [vmem:[%s573_s2 + $0x80] sm:$0xff]  ;;  %v33_v26 = vld [vmem:[%s573_s2 + $0x88] sm:$0xff] }
   0x7   :  { %398 = vmatmul.mubr.msk.f32.vlgmr.msra.gmra.mrb[0].mxu1 %vm116_vm3, %v14_v11  ;;  %444 = vmatprep.subr.bf16.mxu0 %v468_v0  ;;  %v457_v25 = vpack.c.bf16 %v32_v24, %v31_v22  ;;  %v34_v27 = vld [vmem:[%s573_s2 + $0x90] sm:$0xff]  ;;  %v360_v31 = vld [vmem:[%s573_s2 + $0x18] ss:$0 sm:$0xff]  ;;  %v36_v38 = vld [vmem:[%s573_s2 + $0xa0] sm:$0xff] }
   0x8   :  { %435 = vmatprep.mubr.msk.f32.mxu1 %vm470_vm2, %v469_v1  ;;  %455 = vmatpush3.bf16.msra.mxu1 %v454_v23  ;;  %v460_v28 = vpack.c.bf16 %v34_v27, %v33_v26  ;;  %v35_v37 = vld [vmem:[%s573_s2 + $0x98] sm:$0xff]  ;;  %v361_v40 = vld [vmem:[%s573_s2 + $0x60] ss:$0 sm:$0xff]  ;;  %v363_v45 = vld [vmem:[%s573_s2 + $0xa8] ss:$0 sm:$0xff] }
   0x9   :  { %456 = vmatprep.subr.bf16.mxu1 %v468_v0  ;;  %v463_v39 = vpack.c.bf16 %v36_v38, %v35_v37 }
   0xa   :  { %446 = vmatpush3.bf16.msra.mxu0 %v445_v13 }
   0xb   :  { %447 = vmatprep.subr.bf16.mxu0 %v468_v0 }
   0xc   :  { %458 = vmatpush3.bf16.msra.mxu1 %v457_v25 }
   0xd   :  { %459 = vmatprep.subr.bf16.mxu1 %v468_v0 }
   0xe   :  { %449 = vmatpush3.bf16.msra.mxu0 %v448_v16 }
   0xf   :  { %450 = vmatprep.subr.bf16.mxu0 %v468_v0 }
  0x10   :  { %461 = vmatpush3.bf16.msra.mxu1 %v460_v28 }
  0x11   :  { %462 = vmatprep.subr.bf16.mxu1 %v468_v0 }
  0x12   :  { %452 = vmatpush3.bf16.msra.mxu0 %v451_v19 }
  0x14   :  { %464 = vmatpush3.bf16.msra.mxu1 %v463_v39 }
  0xd6   :  { %v112_v29 = vpop.f32.mrb[0].mxu0 }
  0xd7   :  { %v392_v30 = vpop.f32.mrb[1].mxu0 }
  0xda   :  { %v186_v32 = vpop.f32.mrb[0].mxu1 }
  0xdb   :  { %v187_v33 = vadd.f32 %v186_v32, %v112_v29  ;;  %v399_v34 = vpop.f32.mrb[1].mxu1 }
  0xdd   :  { %v194_v35 = vadd.f32 %v360_v31, %v187_v33 }
  0xdf   :  { %v195_v36 = vmax.f32 %v194_v35, 0.0 }
  0xe1   :  { %417 = vmatmul.mubr.msk.f32.vlgmr.msra.gmra.mrb[2].mxu0 %vm200_vm4, %v195_v36 }
 0x1b4   :  { %v270_v41 = vpop.f32.mrb[2].mxu0 }
 0x1b5   :  { %v271_v42 = vadd.f32 %v361_v40, %v270_v41  ;;  %v418_v43 = vpop.f32.mrb[3].mxu0 }
 0x1b7   :  { %v274_v44 = vmax.f32 %v271_v42, 0.0 }
 0x1b9   :  { %436 = vmatmul.mubr.msk.f32.vlgmr.msra.gmra.mrb[2].mxu1 %vm200_vm4, %v274_v44 }
 0x28c   :  { %v348_v46 = vpop.f32.mrb[2].mxu1 }
 0x28d   :  { %v349_v47 = vadd.f32 %v363_v45, %v348_v46  ;;  %v437_v48 = vpop.f32.mrb[3].mxu1 }
 0x28f   :  { %352 = vst.msk [vmem:[%s576_s3] sm:$0xff] %vm200_vm4, %v349_v47 }

</bundles_post_ra>
